<compile_context>
chip_gen: v7x
topology: tpu7x:2x2x1
jax: 0.10.0
libtpu: 0.0.40
codegen_flags: <defaults>
</compile_context>

<pallas_src>
import functools

import jax
import jax.numpy as jnp
from jax.experimental import pallas as pl
from jax.experimental.pallas import tpu as pltpu


# ---------------------------------------------------------------------------
# Kernels
# ---------------------------------------------------------------------------
def _dice_kernel_rows(logits_ref, tgt_ref, out_ref, acc_ref, *,
                      num_rows, n_full):
    """Row layout (HW % 128 == 0): logits block (C, S, 128), targets (S, 128).

    acc_ref: (3, C, S, 128) f32 scratch:
      [0] sum(probas * onehot), [1] sum(probas), [2] sum(onehot)
    out_ref: (3, C, 128) lane-dense partial slab per (batch, part).
    """
    t = pl.program_id(2)
    g = pl.program_id(1) * pl.num_programs(2) + t   # global row-tile index

    @pl.when(t == 0)
    def _():
        acc_ref[...] = jnp.zeros_like(acc_ref)

    x = logits_ref[...].astype(jnp.float32)          # (C, S, 128)
    c, s, _ = x.shape

    # Softmax over the class axis (leading dim): C-1 elementwise VALU max/add
    # over full (S, 128) vregs, one EUP exp, one EUP approximate reciprocal.
    m = jnp.max(x, axis=0, keepdims=True)            # (1, S, 128)
    e = jnp.exp(x - m)
    inv = pl.reciprocal(jnp.sum(e, axis=0, keepdims=True), approx=True)
    probas = e * inv                                  # (C, S, 128)

    # One-hot folded into a compare (no float one-hot tensor).
    tgt = tgt_ref[...].astype(jnp.int32)              # (S, 128)
    cls = jax.lax.broadcasted_iota(jnp.int32, (c, s, 128), 0)
    hit = cls == tgt[None]                            # (C, S, 128) bool

    @pl.when(g < n_full)                              # fully-valid tile
    def _():
        acc_ref[0] += jnp.where(hit, probas, 0.0)
        acc_ref[1] += probas
        acc_ref[2] += jnp.where(hit, 1.0, 0.0)

    @pl.when(g >= n_full)                             # boundary / overhang tile
    def _():
        # Select-based masking only: garbage (possibly NaN/Inf) rows beyond the
        # true extent never reach the accumulators.
        row = jax.lax.broadcasted_iota(jnp.int32, (s, 128), 0) + g * s
        valid = (row < num_rows)[None]                # (1, S, 128)
        hv = jnp.logical_and(hit, valid)
        acc_ref[0] += jnp.where(hv, probas, 0.0)
        acc_ref[1] += jnp.where(valid, probas, 0.0)
        acc_ref[2] += jnp.where(hv, 1.0, 0.0)

    @pl.when(t == pl.num_programs(2) - 1)
    def _():
        # Single cross-sublane reduce per (batch, part); lane-dense store.
        out_ref[...] = jnp.sum(acc_ref[...], axis=2)  # (3, C, 128)


def _dice_kernel_lanes(logits_ref, tgt_ref, out_ref, *, hw, n_full):
    """Lane layout (ragged HW): logits block (C, tile_p), targets (1, tile_p).

    Accumulates directly into the resident output block (3, C, tile_p); the
    lane reduction happens in the JAX epilogue.
    """
    t = pl.program_id(2)
    g = pl.program_id(1) * pl.num_programs(2) + t     # global lane-tile index

    @pl.when(t == 0)
    def _():
        out_ref[...] = jnp.zeros_like(out_ref)

    x = logits_ref[...].astype(jnp.float32)           # (C, tp)
    c, tp = x.shape

    m = jnp.max(x, axis=0, keepdims=True)             # softmax over classes
    e = jnp.exp(x - m)
    inv = pl.reciprocal(jnp.sum(e, axis=0, keepdims=True), approx=True)
    probas = e * inv                                   # (C, tp)

    tgt = tgt_ref[...].astype(jnp.int32)               # (1, tp)
    cls = jax.lax.broadcasted_iota(jnp.int32, (c, tp), 0)
    hit = cls == tgt                                   # (C, tp) bool

    @pl.when(g < n_full)                               # fully-valid tile
    def _():
        out_ref[0] += jnp.where(hit, probas, 0.0)
        out_ref[1] += probas
        out_ref[2] += jnp.where(hit, 1.0, 0.0)

    @pl.when(g >= n_full)                              # tail tile: lane mask
    def _():
        lane = jax.lax.broadcasted_iota(jnp.int32, (1, tp), 1) + g * tp
        valid = lane < hw                               # (1, tp)
        hv = jnp.logical_and(hit, valid)
        out_ref[0] += jnp.where(hv, probas, 0.0)
        out_ref[1] += jnp.where(valid, probas, 0.0)
        out_ref[2] += jnp.where(hv, 1.0, 0.0)


# ---------------------------------------------------------------------------
# Wrapper
# ---------------------------------------------------------------------------
def dice_loss(inputs, targets, eps=1e-07, max_pixels_per_step=None):
    """inputs: (N, C, H, W) float logits (f32 or bf16);
    targets: (N, 1, H, W) (or (N, H, W)) integer class ids.

    Matches DiceLoss.forward: softmax over C, one-hot targets, sums over
    (0, 2, 3), loss = 1 - mean_c((2*intersection + eps) / (cardinality + eps)).
    """
    n, c, h, w = inputs.shape
    hw = h * w

    if jnp.issubdtype(targets.dtype, jnp.floating):
        targets = targets.astype(jnp.int32)
    tgt = targets.reshape(n, hw)     # free contiguous view; keep narrow dtype

    # Tile-pixel budget: ~10 MiB of live per-step VMEM (2x double-buffered
    # input block + f32 accumulator + temps), conservative across v5e's 16 MiB
    # scoped default, v6e, and v7x's 64 MiB physical VMEM.
    if max_pixels_per_step is None:
        budget = 10 * 1024 * 1024
        per_pixel = c * (2 * inputs.dtype.itemsize + 40) + 16
        max_pixels_per_step = int(max(1024, min(32768, budget // per_pixel)))

    compiler_params = pltpu.CompilerParams(
        dimension_semantics=("parallel", "parallel", "arbitrary"),
        vmem_limit_bytes=32 * 1024 * 1024,
    )

    if hw % 128 == 0:
        # ------------------------- row layout -------------------------------
        r = hw // 128
        s_cap = max(8, (max_pixels_per_step // 128) // 8 * 8)
        if n == 1 and r >= 16:
            # Guarantee >= 2 spatial tiles so the P-split below can use both
            # v7x TensorCores even for batch-1 inputs.
            s_cap = min(s_cap, max(8, (r // 2) // 8 * 8))
        if r <= s_cap:
            s = r                                   # single row tile, no mask
        else:
            n_t = pl.cdiv(r, s_cap)
            s = ((pl.cdiv(r, n_t) + 7) // 8) * 8    # balanced, minimal overhang

        total = pl.cdiv(r, s)
        n_full = r // s
        p_split = 2 if (n == 1 and total >= 2) else 1
        t_steps = pl.cdiv(total, p_split)

        logits = inputs.reshape(n, c, r, 128)       # free contiguous view
        tgt_a = tgt.reshape(n, r, 128)

        def lg_map(b, p, t):
            return (b, 0, jnp.minimum(p * t_steps + t, total - 1), 0)

        def tg_map(b, p, t):
            return (b, jnp.minimum(p * t_steps + t, total - 1), 0)

        def out_map(b, p, t):
            return (b * p_split + p, 0, 0, 0)

        kern = functools.partial(_dice_kernel_rows, num_rows=r, n_full=n_full)
        out = pl.pallas_call(
            kern,
            out_shape=jax.ShapeDtypeStruct((n * p_split, 3, c, 128),
                                           jnp.float32),
            grid_spec=pltpu.PrefetchScalarGridSpec(
                num_scalar_prefetch=0,
                grid=(n, p_split, t_steps),
                in_specs=[
                    pl.BlockSpec((pl.Squeezed(), c, s, 128), lg_map),
                    pl.BlockSpec((pl.Squeezed(), s, 128), tg_map),
                ],
                out_specs=pl.BlockSpec((pl.Squeezed(), 3, c, 128), out_map),
                scratch_shapes=[pltpu.VMEM((3, c, s, 128), jnp.float32)],
            ),
            compiler_params=compiler_params,
        )(logits, tgt_a)
    else:
        # ------------------------ lane layout (ragged HW) -------------------
        cap = max_pixels_per_step
        if n == 1 and hw >= 256:
            cap = min(cap, max(128, hw // 2))       # force >= 2 tiles for N==1
        if hw <= cap:
            tile_p = hw                             # single tile, full extent
        else:
            cap128 = max(128, (cap // 128) * 128)
            n_t = pl.cdiv(hw, cap128)
            tile_p = ((pl.cdiv(hw, n_t) + 127) // 128) * 128

        total = pl.cdiv(hw, tile_p)
        n_full = hw // tile_p
        p_split = 2 if (n == 1 and total >= 2) else 1
        t_steps = pl.cdiv(total, p_split)

        logits = inputs.reshape(n, c, hw)           # free contiguous view
        tgt_b = tgt.reshape(n, 1, hw)

        def lg_map(b, p, t):
            return (b, 0, jnp.minimum(p * t_steps + t, total - 1))

        def tg_map(b, p, t):
            return (b, 0, jnp.minimum(p * t_steps + t, total - 1))

        def out_map(b, p, t):
            return (b * p_split + p, 0, 0, 0)

        kern = functools.partial(_dice_kernel_lanes, hw=hw, n_full=n_full)
        out = pl.pallas_call(
            kern,
            out_shape=jax.ShapeDtypeStruct((n * p_split, 3, c, tile_p),
                                           jnp.float32),
            grid_spec=pltpu.PrefetchScalarGridSpec(
                num_scalar_prefetch=0,
                grid=(n, p_split, t_steps),
                in_specs=[
                    pl.BlockSpec((pl.Squeezed(), c, tile_p), lg_map),
                    pl.BlockSpec((pl.Squeezed(), 1, tile_p), tg_map),
                ],
                out_specs=pl.BlockSpec((pl.Squeezed(), 3, c, tile_p), out_map),
            ),
            compiler_params=compiler_params,
        )(logits, tgt_b)

    # Tiny JAX epilogue: combine per-(batch, part) lane-dense partial slabs.
    sums = jnp.sum(out, axis=(0, 3))                # (3, C)
    intersection = 2.0 * sums[0] + eps
    cardinality = sums[1] + sums[2] + eps
    return 1.0 - jnp.mean(intersection / cardinality)


# ---------------------------------------------------------------------------
# Reference + self-test
# ---------------------------------------------------------------------------
def _ref_dice(x, t, eps=1e-07):
    c = x.shape[1]
    probas = jax.nn.softmax(x.astype(jnp.float32), axis=1)
    one_hot = jax.nn.one_hot(t[:, 0], c, axis=1, dtype=jnp.float32)
    inter = 2.0 * jnp.sum(probas * one_hot, axis=(0, 2, 3)) + eps
    card = (jnp.sum(probas, axis=(0, 2, 3))
            + jnp.sum(one_hot, axis=(0, 2, 3)) + eps)
    return 1.0 - jnp.mean(inter / card)


if __name__ == "__main__":
    key = jax.random.PRNGKey(0)
    k1, k2, k3, k4, k5, k6 = jax.random.split(key, 6)

    # Tolerance is relaxed vs. exact f32 because the kernel uses the EUP
    # approximate reciprocal for the softmax denominator; structural bugs show
    # up as O(0.01+) differences.
    tol = 1e-3

    # 1) HW % 128 == 0 -> row layout (C, S, 128), full-vreg per-class slices.
    n, c, h, w = 2, 4, 16, 16
    x = jax.random.normal(k1, (n, c, h, w), dtype=jnp.float32)
    t = jax.random.randint(k2, (n, 1, h, w), 0, c, dtype=jnp.int32)
    loss = jax.block_until_ready(jax.jit(dice_loss)(x, t))
    ref = _ref_dice(x, t)
    assert abs(float(loss) - float(ref)) < tol, (float(loss), float(ref))

    # 2) Ragged HW (130) with 128-lane tiles -> lane layout, multi-tile
    #    accumulation, in-kernel tail mask (no jnp.pad copy of the logits).
    n2, c2, h2, w2 = 2, 4, 10, 13
    x2 = jax.random.normal(k3, (n2, c2, h2, w2), dtype=jnp.float32)
    t2 = jax.random.randint(k4, (n2, 1, h2, w2), 0, c2, dtype=jnp.int32)
    f2 = jax.jit(functools.partial(dice_loss, max_pixels_per_step=128))
    loss2 = jax.block_until_ready(f2(x2, t2))
    ref2 = _ref_dice(x2, t2)
    assert abs(float(loss2) - float(ref2)) < tol, (float(loss2), float(ref2))

    # 3) N == 1 -> spatial tiles split into 2 "parallel" parts (megacore) with
    #    per-part output slabs, plus a masked boundary row tile (R=12, S=8).
    n3, c3, h3, w3 = 1, 4, 48, 32
    x3 = jax.random.normal(k5, (n3, c3, h3, w3), dtype=jnp.float32)
    t3 = jax.random.randint(k6, (n3, 1, h3, w3), 0, c3, dtype=jnp.int32)
    f3 = jax.jit(functools.partial(dice_loss, max_pixels_per_step=1024))
    loss3 = jax.block_until_ready(f3(x3, t3))
    ref3 = _ref_dice(x3, t3)
    assert abs(float(loss3) - float(ref3)) < tol, (float(loss3), float(ref3))

    print("KERNEL_OK")
</pallas_src>

<mosaic_0001>
module attributes {stable_mosaic.version = 11 : i64} {
  func.func @_dice_kernel_rows(%arg0: i32, %arg1: i32, %arg2: i32, %arg3: memref<1x4x2x128xf32, #tpu.memory_space<vmem>>, %arg4: memref<1x2x128xi32, #tpu.memory_space<vmem>>, %arg5: memref<1x3x4x128xf32, #tpu.memory_space<vmem>>, %arg6: memref<3x4x2x128xf32, #tpu.memory_space<vmem>>) attributes {dimension_semantics = [#tpu.dimension_semantics<parallel>, #tpu.dimension_semantics<parallel>, #tpu.dimension_semantics<arbitrary>], iteration_bounds = array<i64: 2, 1, 1>, scalar_prefetch = 0 : i64, scratch_operands = 1 : i64, tpu.core_type = #tpu.core_type<tc>, window_params = [{transform_indices = @transform_0, window_bounds = array<i64: 1, 4, 2, 128>}, {transform_indices = @transform_1, window_bounds = array<i64: 1, 2, 128>}, {transform_indices = @transform_2, window_bounds = array<i64: 1, 3, 4, 128>}]} {
    %c1_i32 = arith.constant 1 : i32
    %0 = arith.muli %arg1, %c1_i32 : i32
    %1 = arith.addi %0, %arg2 : i32
    %c0_i32 = arith.constant 0 : i32
    %2 = arith.cmpi eq, %arg2, %c0_i32 : i32
    %3 = arith.extui %2 : i1 to i32
    %c0_i32_0 = arith.constant 0 : i32
    %4 = arith.cmpi ne, %3, %c0_i32_0 : i32
    scf.if %4 {
      %cst_14 = arith.constant 0.000000e+00 : f32
      %32 = vector.broadcast %cst_14 : f32 to vector<3x4x2x128xf32>
      %c0_15 = arith.constant 0 : index
      %c0_16 = arith.constant 0 : index
      %c0_17 = arith.constant 0 : index
      %c0_18 = arith.constant 0 : index
      %33 = vector.load %arg6[%c0_15, %c0_16, %c0_17, %c0_18] : memref<3x4x2x128xf32, #tpu.memory_space<vmem>>, vector<3x4x2x128xf32>
      tpu.vector_store %arg6[%c0_15, %c0_16, %c0_17, %c0_18], %32 {strides = array<i32>} : memref<3x4x2x128xf32, #tpu.memory_space<vmem>>, vector<3x4x2x128xf32>,
    } else {
    }
    %c0 = arith.constant 0 : index
    %c0_1 = arith.constant 0 : index
    %c0_2 = arith.constant 0 : index
    %c0_3 = arith.constant 0 : index
    %5 = vector.load %arg3[%c0, %c0_1, %c0_2, %c0_3] : memref<1x4x2x128xf32, #tpu.memory_space<vmem>>, vector<1x4x2x128xf32>
    %6 = vector.shape_cast %5 : vector<1x4x2x128xf32> to vector<4x2x128xf32>
    %cst = arith.constant dense<0xFF800000> : vector<2x128xf32>
    %7 = vector.multi_reduction <maximumf>, %6, %cst [0] : vector<4x2x128xf32> to vector<2x128xf32>
    %8 = vector.shape_cast %7 : vector<2x128xf32> to vector<1x2x128xf32>
    %9 = vector.broadcast %8 : vector<1x2x128xf32> to vector<4x2x128xf32>
    %10 = arith.subf %6, %9 : vector<4x2x128xf32>
    %11 = math.exp %10 : vector<4x2x128xf32>
    %cst_4 = arith.constant dense<0.000000e+00> : vector<2x128xf32>
    %12 = vector.multi_reduction <add>, %11, %cst_4 [0] : vector<4x2x128xf32> to vector<2x128xf32>
    %13 = vector.shape_cast %12 : vector<2x128xf32> to vector<1x2x128xf32>
    %14 = tpu.reciprocal %13 {approx = true} : vector<1x2x128xf32> -> vector<1x2x128xf32>
    %15 = vector.broadcast %14 : vector<1x2x128xf32> to vector<4x2x128xf32>
    %16 = arith.mulf %11, %15 : vector<4x2x128xf32>
    %c0_5 = arith.constant 0 : index
    %c0_6 = arith.constant 0 : index
    %c0_7 = arith.constant 0 : index
    %17 = vector.load %arg4[%c0_5, %c0_6, %c0_7] : memref<1x2x128xi32, #tpu.memory_space<vmem>>, vector<1x2x128xi32>
    %18 = vector.shape_cast %17 : vector<1x2x128xi32> to vector<2x128xi32>
    %19 = tpu.iota {dimensions = array<i32: 0>} : vector<4x2x128xi32>
    %20 = vector.shape_cast %18 : vector<2x128xi32> to vector<1x2x128xi32>
    %21 = vector.broadcast %20 : vector<1x2x128xi32> to vector<4x2x128xi32>
    %22 = arith.cmpi eq, %19, %21 : vector<4x2x128xi32>
    %c1_i32_8 = arith.constant 1 : i32
    %23 = arith.cmpi slt, %1, %c1_i32_8 : i32
    %24 = arith.extui %23 : i1 to i32
    %c0_i32_9 = arith.constant 0 : i32
    %25 = arith.cmpi ne, %24, %c0_i32_9 : i32
    scf.if %25 {
      %c0_14 = arith.constant 0 : index
      %c0_15 = arith.constant 0 : index
      %c0_16 = arith.constant 0 : index
      %c0_17 = arith.constant 0 : index
      %32 = vector.load %arg6[%c0_14, %c0_15, %c0_16, %c0_17] : memref<3x4x2x128xf32, #tpu.memory_space<vmem>>, vector<1x4x2x128xf32>
      %33 = vector.shape_cast %32 : vector<1x4x2x128xf32> to vector<4x2x128xf32>
      %cst_18 = arith.constant 0.000000e+00 : f32
      %34 = vector.broadcast %cst_18 : f32 to vector<4x2x128xf32>
      %35 = arith.select %22, %16, %34 : vector<4x2x128xi1>, vector<4x2x128xf32>
      %36 = arith.addf %33, %35 : vector<4x2x128xf32>
      %c0_19 = arith.constant 0 : index
      %c0_20 = arith.constant 0 : index
      %c0_21 = arith.constant 0 : index
      %c0_22 = arith.constant 0 : index
      %37 = vector.load %arg6[%c0_19, %c0_20, %c0_21, %c0_22] : memref<3x4x2x128xf32, #tpu.memory_space<vmem>>, vector<1x4x2x128xf32>
      %38 = vector.shape_cast %37 : vector<1x4x2x128xf32> to vector<4x2x128xf32>
      %39 = vector.shape_cast %36 : vector<4x2x128xf32> to vector<1x4x2x128xf32>
      tpu.vector_store %arg6[%c0_19, %c0_20, %c0_21, %c0_22], %39 {strides = array<i32>} : memref<3x4x2x128xf32, #tpu.memory_space<vmem>>, vector<1x4x2x128xf32>,
      %c1 = arith.constant 1 : index
      %c0_23 = arith.constant 0 : index
      %c0_24 = arith.constant 0 : index
      %c0_25 = arith.constant 0 : index
      %40 = vector.load %arg6[%c1, %c0_23, %c0_24, %c0_25] : memref<3x4x2x128xf32, #tpu.memory_space<vmem>>, vector<1x4x2x128xf32>
      %41 = vector.shape_cast %40 : vector<1x4x2x128xf32> to vector<4x2x128xf32>
      %42 = arith.addf %41, %16 : vector<4x2x128xf32>
      %c1_26 = arith.constant 1 : index
      %c0_27 = arith.constant 0 : index
      %c0_28 = arith.constant 0 : index
      %c0_29 = arith.constant 0 : index
      %43 = vector.load %arg6[%c1_26, %c0_27, %c0_28, %c0_29] : memref<3x4x2x128xf32, #tpu.memory_space<vmem>>, vector<1x4x2x128xf32>
      %44 = vector.shape_cast %43 : vector<1x4x2x128xf32> to vector<4x2x128xf32>
      %45 = vector.shape_cast %42 : vector<4x2x128xf32> to vector<1x4x2x128xf32>
      tpu.vector_store %arg6[%c1_26, %c0_27, %c0_28, %c0_29], %45 {strides = array<i32>} : memref<3x4x2x128xf32, #tpu.memory_space<vmem>>, vector<1x4x2x128xf32>,
      %c2 = arith.constant 2 : index
      %c0_30 = arith.constant 0 : index
      %c0_31 = arith.constant 0 : index
      %c0_32 = arith.constant 0 : index
      %46 = vector.load %arg6[%c2, %c0_30, %c0_31, %c0_32] : memref<3x4x2x128xf32, #tpu.memory_space<vmem>>, vector<1x4x2x128xf32>
      %47 = vector.shape_cast %46 : vector<1x4x2x128xf32> to vector<4x2x128xf32>
      %cst_33 = arith.constant 1.000000e+00 : f32
      %cst_34 = arith.constant 0.000000e+00 : f32
      %48 = vector.broadcast %cst_33 : f32 to vector<4x2x128xf32>
      %49 = vector.broadcast %cst_34 : f32 to vector<4x2x128xf32>
      %50 = arith.select %22, %48, %49 : vector<4x2x128xi1>, vector<4x2x128xf32>
      %51 = arith.addf %47, %50 : vector<4x2x128xf32>
      %c2_35 = arith.constant 2 : index
      %c0_36 = arith.constant 0 : index
      %c0_37 = arith.constant 0 : index
      %c0_38 = arith.constant 0 : index
      %52 = vector.load %arg6[%c2_35, %c0_36, %c0_37, %c0_38] : memref<3x4x2x128xf32, #tpu.memory_space<vmem>>, vector<1x4x2x128xf32>
      %53 = vector.shape_cast %52 : vector<1x4x2x128xf32> to vector<4x2x128xf32>
      %54 = vector.shape_cast %51 : vector<4x2x128xf32> to vector<1x4x2x128xf32>
      tpu.vector_store %arg6[%c2_35, %c0_36, %c0_37, %c0_38], %54 {strides = array<i32>} : memref<3x4x2x128xf32, #tpu.memory_space<vmem>>, vector<1x4x2x128xf32>,
    } else {
    }
    %c1_i32_10 = arith.constant 1 : i32
    %26 = arith.cmpi sge, %1, %c1_i32_10 : i32
    %27 = arith.extui %26 : i1 to i32
    %c0_i32_11 = arith.constant 0 : i32
    %28 = arith.cmpi ne, %27, %c0_i32_11 : i32
    scf.if %28 {
      %32 = tpu.iota {dimensions = array<i32: 0>} : vector<2x128xi32>
      %c2_i32 = arith.constant 2 : i32
      %33 = arith.muli %1, %c2_i32 : i32
      %34 = vector.broadcast %33 : i32 to vector<2x128xi32>
      %35 = arith.addi %32, %34 : vector<2x128xi32>
      %c2_i32_14 = arith.constant 2 : i32
      %36 = vector.broadcast %c2_i32_14 : i32 to vector<2x128xi32>
      %37 = arith.cmpi slt, %35, %36 : vector<2x128xi32>
      %38 = vector.shape_cast %37 : vector<2x128xi1> to vector<1x2x128xi1>
      %39 = vector.broadcast %38 : vector<1x2x128xi1> to vector<4x2x128xi1>
      %40 = arith.andi %22, %39 : vector<4x2x128xi1>
      %c0_15 = arith.constant 0 : index
      %c0_16 = arith.constant 0 : index
      %c0_17 = arith.constant 0 : index
      %c0_18 = arith.constant 0 : index
      %41 = vector.load %arg6[%c0_15, %c0_16, %c0_17, %c0_18] : memref<3x4x2x128xf32, #tpu.memory_space<vmem>>, vector<1x4x2x128xf32>
      %42 = vector.shape_cast %41 : vector<1x4x2x128xf32> to vector<4x2x128xf32>
      %cst_19 = arith.constant 0.000000e+00 : f32
      %43 = vector.broadcast %cst_19 : f32 to vector<4x2x128xf32>
      %44 = arith.select %40, %16, %43 : vector<4x2x128xi1>, vector<4x2x128xf32>
      %45 = arith.addf %42, %44 : vector<4x2x128xf32>
      %c0_20 = arith.constant 0 : index
      %c0_21 = arith.constant 0 : index
      %c0_22 = arith.constant 0 : index
      %c0_23 = arith.constant 0 : index
      %46 = vector.load %arg6[%c0_20, %c0_21, %c0_22, %c0_23] : memref<3x4x2x128xf32, #tpu.memory_space<vmem>>, vector<1x4x2x128xf32>
      %47 = vector.shape_cast %46 : vector<1x4x2x128xf32> to vector<4x2x128xf32>
      %48 = vector.shape_cast %45 : vector<4x2x128xf32> to vector<1x4x2x128xf32>
      tpu.vector_store %arg6[%c0_20, %c0_21, %c0_22, %c0_23], %48 {strides = array<i32>} : memref<3x4x2x128xf32, #tpu.memory_space<vmem>>, vector<1x4x2x128xf32>,
      %c1 = arith.constant 1 : index
      %c0_24 = arith.constant 0 : index
      %c0_25 = arith.constant 0 : index
      %c0_26 = arith.constant 0 : index
      %49 = vector.load %arg6[%c1, %c0_24, %c0_25, %c0_26] : memref<3x4x2x128xf32, #tpu.memory_space<vmem>>, vector<1x4x2x128xf32>
      %50 = vector.shape_cast %49 : vector<1x4x2x128xf32> to vector<4x2x128xf32>
      %cst_27 = arith.constant 0.000000e+00 : f32
      %51 = vector.shape_cast %38 : vector<1x2x128xi1> to vector<1x2x128xi1>
      %52 = vector.broadcast %51 : vector<1x2x128xi1> to vector<4x2x128xi1>
      %53 = vector.broadcast %cst_27 : f32 to vector<4x2x128xf32>
      %54 = arith.select %52, %16, %53 : vector<4x2x128xi1>, vector<4x2x128xf32>
      %55 = arith.addf %50, %54 : vector<4x2x128xf32>
      %c1_28 = arith.constant 1 : index
      %c0_29 = arith.constant 0 : index
      %c0_30 = arith.constant 0 : index
      %c0_31 = arith.constant 0 : index
      %56 = vector.load %arg6[%c1_28, %c0_29, %c0_30, %c0_31] : memref<3x4x2x128xf32, #tpu.memory_space<vmem>>, vector<1x4x2x128xf32>
      %57 = vector.shape_cast %56 : vector<1x4x2x128xf32> to vector<4x2x128xf32>
      %58 = vector.shape_cast %55 : vector<4x2x128xf32> to vector<1x4x2x128xf32>
      tpu.vector_store %arg6[%c1_28, %c0_29, %c0_30, %c0_31], %58 {strides = array<i32>} : memref<3x4x2x128xf32, #tpu.memory_space<vmem>>, vector<1x4x2x128xf32>,
      %c2 = arith.constant 2 : index
      %c0_32 = arith.constant 0 : index
      %c0_33 = arith.constant 0 : index
      %c0_34 = arith.constant 0 : index
      %59 = vector.load %arg6[%c2, %c0_32, %c0_33, %c0_34] : memref<3x4x2x128xf32, #tpu.memory_space<vmem>>, vector<1x4x2x128xf32>
      %60 = vector.shape_cast %59 : vector<1x4x2x128xf32> to vector<4x2x128xf32>
      %cst_35 = arith.constant 1.000000e+00 : f32
      %cst_36 = arith.constant 0.000000e+00 : f32
      %61 = vector.broadcast %cst_35 : f32 to vector<4x2x128xf32>
      %62 = vector.broadcast %cst_36 : f32 to vector<4x2x128xf32>
      %63 = arith.select %40, %61, %62 : vector<4x2x128xi1>, vector<4x2x128xf32>
      %64 = arith.addf %60, %63 : vector<4x2x128xf32>
      %c2_37 = arith.constant 2 : index
      %c0_38 = arith.constant 0 : index
      %c0_39 = arith.constant 0 : index
      %c0_40 = arith.constant 0 : index
      %65 = vector.load %arg6[%c2_37, %c0_38, %c0_39, %c0_40] : memref<3x4x2x128xf32, #tpu.memory_space<vmem>>, vector<1x4x2x128xf32>
      %66 = vector.shape_cast %65 : vector<1x4x2x128xf32> to vector<4x2x128xf32>
      %67 = vector.shape_cast %64 : vector<4x2x128xf32> to vector<1x4x2x128xf32>
      tpu.vector_store %arg6[%c2_37, %c0_38, %c0_39, %c0_40], %67 {strides = array<i32>} : memref<3x4x2x128xf32, #tpu.memory_space<vmem>>, vector<1x4x2x128xf32>,
    } else {
    }
    %c0_i32_12 = arith.constant 0 : i32
    %29 = arith.cmpi eq, %arg2, %c0_i32_12 : i32
    %30 = arith.extui %29 : i1 to i32
    %c0_i32_13 = arith.constant 0 : i32
    %31 = arith.cmpi ne, %30, %c0_i32_13 : i32
    scf.if %31 {
      %c0_14 = arith.constant 0 : index
      %c0_15 = arith.constant 0 : index
      %c0_16 = arith.constant 0 : index
      %c0_17 = arith.constant 0 : index
      %32 = vector.load %arg6[%c0_14, %c0_15, %c0_16, %c0_17] : memref<3x4x2x128xf32, #tpu.memory_space<vmem>>, vector<3x4x2x128xf32>
      %cst_18 = arith.constant dense<0.000000e+00> : vector<3x4x128xf32>
      %33 = vector.multi_reduction <add>, %32, %cst_18 [2] : vector<3x4x2x128xf32> to vector<3x4x128xf32>
      %c0_19 = arith.constant 0 : index
      %c0_20 = arith.constant 0 : index
      %c0_21 = arith.constant 0 : index
      %c0_22 = arith.constant 0 : index
      %34 = vector.load %arg5[%c0_19, %c0_20, %c0_21, %c0_22] : memref<1x3x4x128xf32, #tpu.memory_space<vmem>>, vector<1x3x4x128xf32>
      %35 = vector.shape_cast %34 : vector<1x3x4x128xf32> to vector<3x4x128xf32>
      %36 = vector.shape_cast %33 : vector<3x4x128xf32> to vector<1x3x4x128xf32>
      tpu.vector_store %arg5[%c0_19, %c0_20, %c0_21, %c0_22], %36 {strides = array<i32>} : memref<1x3x4x128xf32, #tpu.memory_space<vmem>>, vector<1x3x4x128xf32>,
    } else {
    }
    return
  }
  func.func @transform_0(%arg0: i32, %arg1: i32, %arg2: i32) -> (i32, i32, i32, i32) {
    %c1_i32 = arith.constant 1 : i32
    %0 = arith.muli %arg1, %c1_i32 : i32
    %1 = arith.addi %0, %arg2 : i32
    %c0_i32 = arith.constant 0 : i32
    %2 = arith.minsi %1, %c0_i32 : i32
    %c0_i32_0 = arith.constant 0 : i32
    %c0_i32_1 = arith.constant 0 : i32
    %c0_i32_2 = arith.constant 0 : i32
    return %arg0, %c0_i32_0, %2, %c0_i32_1 : i32, i32, i32, i32
  }
  func.func @transform_1(%arg0: i32, %arg1: i32, %arg2: i32) -> (i32, i32, i32) {
    %c1_i32 = arith.constant 1 : i32
    %0 = arith.muli %arg1, %c1_i32 : i32
    %1 = arith.addi %0, %arg2 : i32
    %c0_i32 = arith.constant 0 : i32
    %2 = arith.minsi %1, %c0_i32 : i32
    %c0_i32_0 = arith.constant 0 : i32
    %c0_i32_1 = arith.constant 0 : i32
    return %arg0, %2, %c0_i32_0 : i32, i32, i32
  }
  func.func @transform_2(%arg0: i32, %arg1: i32, %arg2: i32) -> (i32, i32, i32, i32) {
    %c1_i32 = arith.constant 1 : i32
    %0 = arith.muli %arg0, %c1_i32 : i32
    %1 = arith.addi %0, %arg1 : i32
    %c0_i32 = arith.constant 0 : i32
    %c0_i32_0 = arith.constant 0 : i32
    %c0_i32_1 = arith.constant 0 : i32
    %c0_i32_2 = arith.constant 0 : i32
    return %1, %c0_i32, %c0_i32_0, %c0_i32_1 : i32, i32, i32, i32
  }
}

</mosaic_0001>

<bundles_post_ra>
// kernel: dice_loss.1
= control target key start
LH: loop header
LB: loop body
LE: loop exit
PB: predicated region body
PF: predicated region fallthrough
CT: control target
= control target key end

     0   :  { %s731_s9 = smov 0   ;;  %s733_s10 = smov 0   ;;  %s829_s0 = inlined_call_operand.vmem [shape: f32[2,4,2,128], index: 0, kind: input, shape index: {}]   ;;  %s830_s1 = inlined_call_operand.vmem [shape: s32[2,2,128], index: 1, kind: input, shape index: {}]   ;;  %s831_s2 = inlined_call_operand.vmem [shape: f32[2,3,4,128], index: 2, kind: output, shape index: {}]  }
   0x1   :  { %s735_s11 = smov 0  }
   0x2 LB: > { %s31_s12 = sadd.s32 1, %s709_s10  ;;  %p647_p0 = scmp.ge.s32.totalorder %s713_s11, 1  ;;  %s713_s11 = sphi %s735_s11, %s12_s11   ;;  %s709_s10 = sphi %s733_s10, %s833_s10   ;;  %s705_s9 = sphi %s731_s9, %s832_s9  }
   0x3   : > { %p33_p1 = scmp.ge.s32.totalorder %s31_s12, 2  ;;  %p176_p2 = scmp.lt.s32.totalorder %s713_s11, 3 }
   0x5   : > { %s835_s12 = smov (%p33_p1, %s31_s12), 0  ;;  %p177_p3 = pnand %p647_p0, %p176_p2 }
   0x6   : > { %p218_p4 = scmp.lt.s32.totalorder (!%p177_p3), %s705_s9, 1  ;;  %v715_v0 = vmov (!%p177_p3), 0.0   ;;  %vm270_vm0 = vcmask (!%p177_p3), 1041408   ;;  %vm534_vm5 = vcmask (!%p177_p3), 1041409   ;;  %vm536_vm6 = vcmask (!%p177_p3), 1042434  }
   0x7   : > { %180 = sbr.rel (%p177_p3) target bundleno = 94 (0x5e), region = 28  ;;  %262 = vst [vmem:[#allocation2 + $0x10] sm:$0x3] (!%p177_p3), %v715_v0  ;;  %254 = vst [vmem:[#allocation2] sm:$0x3] (!%p177_p3), %v715_v0  ;;  %vm538_vm7 = vcmask (!%p177_p3), 1043459  }
   0x8   : > { %255 = vst [vmem:[#allocation2 + $0x2] sm:$0x3] (!%p177_p3), %v715_v0  ;;  %256 = vst [vmem:[#allocation2 + $0x4] sm:$0x3] (!%p177_p3), %v715_v0 }
   0x9   : > { %257 = vst [vmem:[#allocation2 + $0x6] sm:$0x3] (!%p177_p3), %v715_v0  ;;  %258 = vst [vmem:[#allocation2 + $0x8] sm:$0x3] (!%p177_p3), %v715_v0 }
   0xa   : > { %259 = vst [vmem:[#allocation2 + $0xa] sm:$0x3] (!%p177_p3), %v715_v0  ;;  %260 = vst [vmem:[#allocation2 + $0xc] sm:$0x3] (!%p177_p3), %v715_v0 }
   0xb   : > { %261 = vst [vmem:[#allocation2 + $0xe] sm:$0x3] (!%p177_p3), %v715_v0  ;;  %263 = vst [vmem:[#allocation2 + $0x12] sm:$0x3] (!%p177_p3), %v715_v0 }
   0xc   : > { %264 = vst [vmem:[#allocation2 + $0x14] sm:$0x3] (!%p177_p3), %v715_v0  ;;  %265 = vst [vmem:[#allocation2 + $0x16] sm:$0x3] (!%p177_p3), %v715_v0 }
   0xe   : > { %s837_s9 = smov (!%p218_p4, %s705_s9), 1  ;;  %v341_v7 = vld [vmem:[#allocation2 + $0x10] sm:$0x3] }
   0xf   : > { %s654_s13 = sshll.u32 %s837_s9, 3  ;;  %s650_s14 = sshll.u32 %s837_s9, 1 }
  0x10   : > { %s225_s17 = scalar_lea.vmem %s829_s0, %s654_s13  ;;  %s238_s20 = scalar_lea.vmem %s830_s1, %s650_s14 }
  0x11   : > { %v268_v1 = vld [vmem:[%s225_s17 + $0x4] sm:$0x3]  ;;  %v269_v2 = vld [vmem:[%s225_s17 + $0x6] sm:$0x3]  ;;  %v760_v3 = vld [vmem:[%s238_s20] sm:$0x3] }
  0x12   : > { %v273_v4 = vsel %vm270_vm0, %v268_v1, -inf  ;;  %v274_v5 = vsel %vm270_vm0, %v269_v2, -inf  ;;  %vm303_vm1 = vcmp.eq.s32.totalorder %v760_v3, 0  ;;  %vm304_vm2 = vcmp.eq.s32.totalorder %v760_v3, 1  ;;  %v266_v6 = vld [vmem:[%s225_s17] sm:$0x3] }
  0x13   : > { %v345_v8 = vsel %vm303_vm1, 1.0, %v715_v0  ;;  %v342_v9 = vld [vmem:[#allocation2 + $0x12] sm:$0x3]  ;;  %v346_v10 = vsel %vm304_vm2, 1.0, %v715_v0  ;;  %vm305_vm3 = vcmp.eq.s32.totalorder %v760_v3, 2  ;;  %vm306_vm4 = vcmp.eq.s32.totalorder %v760_v3, 3 }
  0x14   : > { %v349_v11 = vadd.f32 %v345_v8, %v341_v7  ;;  %v350_v12 = vadd.f32 %v346_v10, %v342_v9  ;;  %v343_v13 = vld [vmem:[#allocation2 + $0x14] sm:$0x3]  ;;  %v344_v14 = vld [vmem:[#allocation2 + $0x16] sm:$0x3]  ;;  %v347_v15 = vsel %vm305_vm3, 1.0, %v715_v0  ;;  %v348_v16 = vsel %vm306_vm4, 1.0, %v715_v0 }
  0x15   : > { %v267_v17 = vld [vmem:[%s225_s17 + $0x2] sm:$0x3]  ;;  %v271_v18 = vsel %vm270_vm0, %v266_v6, -inf  ;;  %v276_v19 = vmax.f32 %v273_v4, %v274_v5  ;;  %v351_v20 = vadd.f32 %v347_v15, %v343_v13  ;;  %v352_v21 = vadd.f32 %v348_v16, %v344_v14  ;;  %s655_s21 = smul.u32 12, %s837_s9  ;;  %v328_v16 = vld [vmem:[#allocation2 + $0x8] sm:$0x3] }
  0x16   : > { %353 = vst [vmem:[#allocation2 + $0x10] sm:$0x3] %v349_v11  ;;  %354 = vst [vmem:[#allocation2 + $0x12] sm:$0x3] %v350_v12  ;;  %v272_v22 = vsel %vm270_vm0, %v267_v17, -inf }
  0x17   : > { %v275_v23 = vmax.f32 %v271_v18, %v272_v22  ;;  %355 = vst [vmem:[#allocation2 + $0x14] sm:$0x3] %v351_v20  ;;  %356 = vst [vmem:[#allocation2 + $0x16] sm:$0x3] %v352_v21  ;;  %s789_s24 = scalar_lea.vmem %s831_s2, %s655_s21  ;;  %v329_v18 = vld [vmem:[#allocation2 + $0xa] sm:$0x3] }
  0x18   : > { %v331_v20 = vld [vmem:[#allocation2 + $0xe] sm:$0x3] }
  0x19   : > { %v277_v24 = vmax.f32 %v275_v23, %v276_v19  ;;  %v330_v19 = vld [vmem:[#allocation2 + $0xc] sm:$0x3] }
  0x1b   : > { %v278_v25 = vsub.f32 %v266_v6, %v277_v24  ;;  %v279_v26 = vsub.f32 %v267_v17, %v277_v24  ;;  %v280_v27 = vsub.f32 %v268_v1, %v277_v24  ;;  %v281_v28 = vsub.f32 %v269_v2, %v277_v24 }
  0x1d   : > { %v282_v29 = vmul.f32 1.442695, %v278_v25  ;;  %v284_v30 = vmul.f32 1.442695, %v279_v26  ;;  %v286_v31 = vmul.f32 1.442695, %v280_v27 }
  0x1e   : > { %v288_v32 = vmul.f32 1.442695, %v281_v28  ;;  %v434_v33 = vld [vmem:[#allocation2 + $0x10] sm:$0x3]  ;;  %v435_v34 = vld [vmem:[#allocation2 + $0x12] sm:$0x3] }
  0x1f   : > { %681 = vpow2.f32 %v282_v29  ;;  %v436_v35 = vld [vmem:[#allocation2 + $0x14] sm:$0x3]  ;;  %v437_v36 = vld [vmem:[#allocation2 + $0x16] sm:$0x3]  ;;  %v494_v37 = vsel %vm270_vm0, %v434_v33, 0.0  ;;  %v501_v38 = vsel %vm270_vm0, %v435_v34, 0.0 }
  0x20   : > { %683 = vpow2.f32 %v284_v30  ;;  %v495_v39 = vrot.slane %v494_v37, 4  ;;  %v502_v40 = vrot.slane %v501_v38, 4  ;;  %v508_v41 = vsel %vm270_vm0, %v436_v35, 0.0  ;;  %v311_v25 = vld [vmem:[#allocation2] sm:$0x3] }
  0x21   : > { %685 = vpow2.f32 %v286_v31  ;;  %v509_v42 = vrot.slane %v508_v41, 4  ;;  %v515_v43 = vsel %vm270_vm0, %v437_v36, 0.0  ;;  %v312_v26 = vld [vmem:[#allocation2 + $0x2] sm:$0x3]  ;;  %v313_v27 = vld [vmem:[#allocation2 + $0x4] sm:$0x3] }
  0x22   : > { %687 = vpow2.f32 %v288_v32  ;;  %v496_v44 = vadd.f32 %v495_v39, %v494_v37  ;;  %v503_v45 = vadd.f32 %v502_v40, %v501_v38  ;;  %v516_v46 = vrot.slane %v515_v43, 4  ;;  %v314_v28 = vld [vmem:[#allocation2 + $0x6] sm:$0x3] }
  0x23   : > { %v510_v47 = vadd.f32 %v509_v42, %v508_v41 }
  0x24   : > { %v497_v48 = vrot.slane %v496_v44, 2  ;;  %v504_v49 = vrot.slane %v503_v45, 2  ;;  %v517_v50 = vadd.f32 %v516_v46, %v515_v43 }
  0x25   : > { %v511_v51 = vrot.slane %v510_v47, 2 }
  0x26   : > { %v498_v52 = vadd.f32 %v497_v48, %v496_v44  ;;  %v505_v53 = vadd.f32 %v504_v49, %v503_v45  ;;  %v518_v54 = vrot.slane %v517_v50, 2 }
  0x27   : > { %v512_v55 = vadd.f32 %v511_v51, %v510_v47 }
  0x28   : > { %v499_v56 = vrot.slane %v498_v52, 1  ;;  %v506_v57 = vrot.slane %v505_v53, 1  ;;  %v519_v58 = vadd.f32 %v518_v54, %v517_v50 }
  0x29   : > { %v682_v59 = vpop.eup %681  ;;  %v513_v60 = vrot.slane %v512_v55, 1 }
  0x2a   : > { %v684_v61 = vpop.eup %683  ;;  %v290_v62 = vsel %vm270_vm0, %v682_v59, 0.0  ;;  %v500_v63 = vadd.f32 %v499_v56, %v498_v52  ;;  %v507_v0 = vadd.f32 %v506_v57, %v505_v53  ;;  %v520_v1 = vrot.slane %v519_v58, 1 }
  0x2b   : > { %v686_v2 = vpop.eup %685  ;;  %v291_v4 = vsel %vm270_vm0, %v684_v61, 0.0  ;;  %v514_v5 = vadd.f32 %v513_v60, %v512_v55 }
  0x2c   : > { %v688_v6 = vpop.eup %687  ;;  %v292_v7 = vadd.f32 %v291_v4, %v290_v62  ;;  %v293_v8 = vsel %vm270_vm0, %v686_v2, 0.0  ;;  %v521_v9 = vadd.f32 %v520_v1, %v519_v58  ;;  %v543_v10 = vsel %vm534_vm5, %v507_v0, %v500_v63 }
  0x2d   : > { %v295_v11 = vsel %vm270_vm0, %v688_v6, 0.0  ;;  %v544_v12 = vsel %vm536_vm6, %v514_v5, %v543_v10 }
  0x2e   : > { %v294_v13 = vadd.f32 %v293_v8, %v292_v7  ;;  %v545_v14 = vsel %vm538_vm7, %v521_v9, %v544_v12 }
  0x2f   : > { %551 = vst [vmem:[%s789_s24 + $0x8] sm:$0xf] %v545_v14 }
  0x30   : > { %v296_v15 = vadd.f32 %v295_v11, %v294_v13 }
  0x32   : > { %689 = vrcp.f32 %v296_v15 }
  0x3c   : > { %v690_v17 = vpop.eup %689 }
  0x3d   : > { %v298_v21 = vmul.f32 %v690_v17, %v682_v59  ;;  %v299_v22 = vmul.f32 %v690_v17, %v684_v61  ;;  %v300_v23 = vmul.f32 %v690_v17, %v686_v2  ;;  %v301_v24 = vmul.f32 %v690_v17, %v688_v6 }
  0x3f   : > { %v332_v29 = vadd.f32 %v328_v16, %v298_v21  ;;  %v333_v30 = vadd.f32 %v329_v18, %v299_v22  ;;  %v334_v31 = vadd.f32 %v330_v19, %v300_v23  ;;  %v335_v32 = vadd.f32 %v331_v20, %v301_v24 }
  0x40   : > { %v315_v33 = vsel %vm303_vm1, %v298_v21, 0.0  ;;  %v316_v34 = vsel %vm304_vm2, %v299_v22, 0.0  ;;  %v317_v35 = vsel %vm305_vm3, %v300_v23, 0.0  ;;  %v318_v36 = vsel %vm306_vm4, %v301_v24, 0.0 }
  0x41   : > { %336 = vst [vmem:[#allocation2 + $0x8] sm:$0x3] %v332_v29  ;;  %337 = vst [vmem:[#allocation2 + $0xa] sm:$0x3] %v333_v30  ;;  %v319_v37 = vadd.f32 %v315_v33, %v311_v25  ;;  %v320_v38 = vadd.f32 %v316_v34, %v312_v26  ;;  %v321_v39 = vadd.f32 %v317_v35, %v313_v27 }
  0x42   : > { %338 = vst [vmem:[#allocation2 + $0xc] sm:$0x3] %v334_v31  ;;  %339 = vst [vmem:[#allocation2 + $0xe] sm:$0x3] %v335_v32  ;;  %v322_v40 = vadd.f32 %v318_v36, %v314_v28 }
  0x43   : > { %323 = vst [vmem:[#allocation2] sm:$0x3] %v319_v37  ;;  %324 = vst [vmem:[#allocation2 + $0x2] sm:$0x3] %v320_v38 }
  0x44   : > { %325 = vst [vmem:[#allocation2 + $0x4] sm:$0x3] %v321_v39  ;;  %326 = vst [vmem:[#allocation2 + $0x6] sm:$0x3] %v322_v40 }
  0x48   : > { %v430_v41 = vld [vmem:[#allocation2 + $0x8] sm:$0x3]  ;;  %v431_v42 = vld [vmem:[#allocation2 + $0xa] sm:$0x3] }
  0x49   : > { %v432_v43 = vld [vmem:[#allocation2 + $0xc] sm:$0x3]  ;;  %v433_v44 = vld [vmem:[#allocation2 + $0xe] sm:$0x3]  ;;  %v466_v45 = vsel %vm270_vm0, %v430_v41, 0.0  ;;  %v473_v3 = vsel %vm270_vm0, %v431_v42, 0.0 }
  0x4a   : > { %v480_v46 = vsel %vm270_vm0, %v432_v43, 0.0  ;;  %v467_v47 = vrot.slane %v466_v45, 4  ;;  %v474_v48 = vrot.slane %v473_v3, 4  ;;  %v487_v50 = vsel %vm270_vm0, %v433_v44, 0.0  ;;  %v426_v51 = vld [vmem:[#allocation2] sm:$0x3] }
  0x4b   : > { %v481_v49 = vrot.slane %v480_v46, 4  ;;  %v488_v52 = vrot.slane %v487_v50, 4  ;;  %v427_v53 = vld [vmem:[#allocation2 + $0x2] sm:$0x3]  ;;  %v428_v54 = vld [vmem:[#allocation2 + $0x4] sm:$0x3] }
  0x4c   : > { %v438_v55 = vsel %vm270_vm0, %v426_v51, 0.0  ;;  %v468_v56 = vadd.f32 %v467_v47, %v466_v45  ;;  %v475_v57 = vadd.f32 %v474_v48, %v473_v3  ;;  %v429_v59 = vld [vmem:[#allocation2 + $0x6] sm:$0x3]  ;;  %v445_v62 = vsel %vm270_vm0, %v427_v53, 0.0 }
  0x4d   : > { %v482_v58 = vadd.f32 %v481_v49, %v480_v46  ;;  %v439_v60 = vrot.slane %v438_v55, 4  ;;  %v489_v61 = vadd.f32 %v488_v52, %v487_v50  ;;  %v452_v63 = vsel %vm270_vm0, %v428_v54, 0.0 }
  0x4e   : > { %v459_v0 = vsel %vm270_vm0, %v429_v59, 0.0  ;;  %v469_v1 = vrot.slane %v468_v56, 2  ;;  %v476_v2 = vrot.slane %v475_v57, 2  ;;  %v446_v7 = vrot.slane %v445_v62, 4 }
  0x4f   : > { %v483_v4 = vrot.slane %v482_v58, 2  ;;  %v440_v5 = vadd.f32 %v439_v60, %v438_v55  ;;  %v490_v6 = vrot.slane %v489_v61, 2  ;;  %v453_v8 = vrot.slane %v452_v63, 4 }
  0x50   : > { %v460_v9 = vrot.slane %v459_v0, 4  ;;  %v470_v10 = vadd.f32 %v469_v1, %v468_v56  ;;  %v477_v11 = vadd.f32 %v476_v2, %v475_v57  ;;  %v447_v15 = vadd.f32 %v446_v7, %v445_v62 }
  0x51   : > { %v484_v12 = vadd.f32 %v483_v4, %v482_v58  ;;  %v441_v13 = vrot.slane %v440_v5, 2  ;;  %v491_v14 = vadd.f32 %v490_v6, %v489_v61  ;;  %v454_v16 = vadd.f32 %v453_v8, %v452_v63 }
  0x52   : > { %v461_v17 = vadd.f32 %v460_v9, %v459_v0  ;;  %v471_v18 = vrot.slane %v470_v10, 1  ;;  %v478_v19 = vrot.slane %v477_v11, 1  ;;  %v448_v23 = vrot.slane %v447_v15, 2 }
  0x53   : > { %v485_v20 = vrot.slane %v484_v12, 1  ;;  %v442_v21 = vadd.f32 %v441_v13, %v440_v5  ;;  %v492_v22 = vrot.slane %v491_v14, 1  ;;  %v455_v24 = vrot.slane %v454_v16, 2 }
  0x54   : > { %v462_v25 = vrot.slane %v461_v17, 2  ;;  %v472_v26 = vadd.f32 %v471_v18, %v470_v10  ;;  %v479_v27 = vadd.f32 %v478_v19, %v477_v11  ;;  %v449_v30 = vadd.f32 %v448_v23, %v447_v15 }
  0x55   : > { %v486_v28 = vadd.f32 %v485_v20, %v484_v12  ;;  %v443_v29 = vrot.slane %v442_v21, 1  ;;  %v456_v31 = vadd.f32 %v455_v24, %v454_v16  ;;  %v493_v33 = vadd.f32 %v492_v22, %v491_v14 }
  0x56   : > { %v463_v32 = vadd.f32 %v462_v25, %v461_v17  ;;  %v540_v34 = vsel %vm534_vm5, %v479_v27, %v472_v26  ;;  %v450_v37 = vrot.slane %v449_v30, 1 }
  0x57   : > { %v444_v35 = vadd.f32 %v443_v29, %v442_v21  ;;  %v541_v36 = vsel %vm536_vm6, %v486_v28, %v540_v34  ;;  %v457_v38 = vrot.slane %v456_v31, 1 }
  0x58   : > { %v464_v39 = vrot.slane %v463_v32, 1  ;;  %v542_v40 = vsel %vm538_vm7, %v493_v33, %v541_v36  ;;  %v451_v41 = vadd.f32 %v450_v37, %v449_v30 }
  0x59   : > { %550 = vst [vmem:[%s789_s24 + $0x4] sm:$0xf] %v542_v40  ;;  %v458_v42 = vadd.f32 %v457_v38, %v456_v31 }
  0x5a   : > { %v465_v43 = vadd.f32 %v464_v39, %v463_v32  ;;  %v535_v44 = vsel %vm534_vm5, %v451_v41, %v444_v35 }
  0x5b   : > { %v537_v45 = vsel %vm536_vm6, %v458_v42, %v535_v44 }
  0x5c   : > { %v539_v3 = vsel %vm538_vm7, %v465_v43, %v537_v45 }
  0x5d   : > { %549 = vst [vmem:[%s789_s24] sm:$0xf] %v539_v3 }
  0x5e PF: > { %s12_s11 = sadd.s32 1, %s713_s11   ;;  %s832_s9 = smov %s709_s10 }
  0x5f   : > { %p9_p5 = scmp.ge.s32.totalorder %s12_s11, 4   ;;  %s833_s10 = smov %s835_s12 }
  0x61   :  { %11 = sbr.rel (!%p9_p5) target bundleno = 2 (0x2), region = 81 }

</bundles_post_ra>
